<compile_context>
chip_gen: v6e
topology: v6e:2x2x1
jax: 0.10.0
libtpu: 0.0.40
codegen_flags: <defaults>
</compile_context>

<pallas_src>
import jax
import jax.numpy as jnp
from jax import lax
from jax.experimental import pallas as pl
from jax.experimental.pallas import tpu as pltpu

_LANE = 128
_SUBLANE = 8
_CHUNK = 64  # inner-loop rows per step (multiple of every packed sublane multiple)


def _round_up(a, b):
    return ((a + b - 1) // b) * b


def _round_down(a, b):
    return (a // b) * b


def _cdiv(a, b):
    return (a + b - 1) // b


def _num_tensorcores():
    # v7x exposes 2 TensorCores per device; v5e/v6e have 1. Default 1 is always correct.
    try:
        kind = jax.devices()[0].device_kind.lower()
    except Exception:
        return 1
    return 2 if ("v7" in kind or "7x" in kind) else 1


def _make_kernel(tile_rows, chunk, rows_per_core, tiles, need_mask, red_axis):
    groups = tile_rows // chunk
    last_tile_base = (tiles - 1) * tile_rows  # row offset of the (only) masked tile

    def accumulate(x_ref, y_ref, o_ref, masked):
        def body(j, acc):
            r0 = pl.multiple_of(j * chunk, chunk)
            d = (x_ref[pl.ds(r0, chunk), :].astype(jnp.float32)
                 - y_ref[pl.ds(r0, chunk), :].astype(jnp.float32))
            # 1 - cos(d) == 2*sin(d/2)^2 ; the 2* factor is applied once in the wrapper.
            s = jnp.sin(0.5 * d)
            l = s * s
            if masked:
                # Only the last, possibly-overrunning tile pays this mask; garbage
                # (possibly NaN/Inf) rows are zeroed BEFORE accumulation.
                row = (last_tile_base + r0
                       + lax.broadcasted_iota(jnp.int32, l.shape, 0))
                l = jnp.where(row < rows_per_core, l, 0.0)
            # Fold (chunk,128) -> (8,128) with pure VPU adds (no XLU, no big temp).
            return acc + l.reshape(chunk // _SUBLANE, _SUBLANE, _LANE).sum(axis=0)

        acc = lax.fori_loop(0, groups, body,
                            jnp.zeros((_SUBLANE, _LANE), jnp.float32))
        o_ref[...] += acc

    def kernel(x_ref, y_ref, o_ref):
        t = pl.program_id(red_axis)

        @pl.when(t == 0)
        def _init():
            o_ref[...] = jnp.zeros_like(o_ref)

        if need_mask:
            last = pl.num_programs(red_axis) - 1

            @pl.when(t < last)
            def _steady():
                accumulate(x_ref, y_ref, o_ref, False)

            @pl.when(t == last)
            def _tail():
                accumulate(x_ref, y_ref, o_ref, True)
        else:
            accumulate(x_ref, y_ref, o_ref, False)

    return kernel


def cos_loss(x, labels):
    assert x.shape == labels.shape, "x and labels must have matching shapes"
    n = x.size
    itemsize = jnp.dtype(x.dtype).itemsize
    packing = max(1, 4 // itemsize)      # 1 f32, 2 bf16/f16, 4 int8/fp8
    sub_mult = _SUBLANE * packing        # packed sublane multiple

    num_cores = _num_tensorcores()

    xf = jnp.ravel(x)
    yf = jnp.ravel(labels)

    # Never pad just to split across TensorCores.
    if num_cores > 1 and n % (num_cores * _LANE) != 0:
        num_cores = 1

    rows_per_core = _cdiv(_cdiv(n, _LANE), num_cores)

    if n % _LANE != 0 or rows_per_core < sub_mult:
        # Rare ragged / tiny case: minimal zero pad (zeros contribute 0 to the SUM).
        # TODO(synk): a plain-jnp tail sum would avoid this full-array pad copy.
        rows_per_core = max(sub_mult, _round_up(rows_per_core, sub_mult))
        total = num_cores * rows_per_core * _LANE
        xf = jnp.pad(xf, (0, total - n))
        yf = jnp.pad(yf, (0, total - n))

    # Tile sizing: multi-MiB input blocks to amortize the ~0.35us/grid-step overhead.
    # Per-buffer target: 4 MiB on 1-TC parts (v5e/v6e), 2 MiB on v7x (64 MiB VMEM).
    tile_bytes_target = (2 << 20) if num_cores > 1 else (4 << 20)
    max_tile_rows = max(_CHUNK,
                        _round_down(tile_bytes_target // (_LANE * itemsize), _CHUNK))
    if rows_per_core >= _CHUNK:
        chunk = _CHUNK
    else:
        chunk = _round_down(rows_per_core, sub_mult)
    tile_rows = min(max_tile_rows, _round_down(rows_per_core, chunk))
    tiles = _cdiv(rows_per_core, tile_rows)
    need_mask = tiles * tile_rows != rows_per_core

    if num_cores == 1:
        x_in = xf.reshape(rows_per_core, _LANE)
        y_in = yf.reshape(rows_per_core, _LANE)
        grid = (tiles,)
        in_spec = pl.BlockSpec((tile_rows, _LANE), lambda i: (i, 0))
        out_spec = pl.BlockSpec((_SUBLANE, _LANE), lambda i: (0, 0))
        out_shape = jax.ShapeDtypeStruct((_SUBLANE, _LANE), jnp.float32)
        red_axis = 0
        sem_options = [(pltpu.ARBITRARY,)]
    else:
        x_in = xf.reshape(num_cores, rows_per_core, _LANE)
        y_in = yf.reshape(num_cores, rows_per_core, _LANE)
        grid = (num_cores, tiles)
        in_spec = pl.BlockSpec((None, tile_rows, _LANE), lambda c, i: (c, i, 0))
        out_spec = pl.BlockSpec((None, _SUBLANE, _LANE), lambda c, i: (c, 0, 0))
        out_shape = jax.ShapeDtypeStruct((num_cores, _SUBLANE, _LANE), jnp.float32)
        red_axis = 1
        # CORE_PARALLEL actually shards the leading axis across the two TensorCores
        # (plain "parallel" was measured as a near no-op); fall back if it rejects.
        sem_options = [(pltpu.CORE_PARALLEL, pltpu.ARBITRARY),
                       (pltpu.PARALLEL, pltpu.ARBITRARY)]

    kernel = _make_kernel(tile_rows, chunk, rows_per_core, tiles, need_mask, red_axis)
    vmem_limit = (48 << 20) if num_cores > 1 else (64 << 20)

    partial = None
    err = None
    for sems in sem_options:
        try:
            partial = pl.pallas_call(
                kernel,
                out_shape=out_shape,
                grid=grid,
                in_specs=[in_spec, in_spec],
                # Same output block across the reduction axis -> resident accumulator.
                out_specs=out_spec,
                compiler_params=pltpu.CompilerParams(
                    dimension_semantics=sems,
                    vmem_limit_bytes=vmem_limit),
            )(x_in, y_in)
            break
        except Exception as e:  # only reachable if CORE_PARALLEL fails to lower
            err = e
            partial = None
    if partial is None:
        raise err

    # Tiny final cross-lane reduce, the hoisted 2* factor, divide by the TRUE count.
    return 2.0 * jnp.sum(partial) / n


if __name__ == "__main__":
    key = jax.random.PRNGKey(0)
    kx, kl = jax.random.split(key)
    # small NCHW-like shapes consistent with a dense regression target
    x = jax.random.normal(kx, (2, 4, 16, 16), dtype=jnp.float32)
    labels = jax.random.normal(kl, (2, 4, 16, 16), dtype=jnp.float32)

    result = cos_loss(x, labels)
    jax.block_until_ready(result)

    # sanity check against plain JAX reference
    ref = jnp.mean(1.0 - jnp.cos(x - labels))
    assert jnp.allclose(result, ref, atol=1e-5, rtol=1e-5), (result, ref)

    print("KERNEL_OK")
</pallas_src>

<mosaic_0001>
module attributes {stable_mosaic.version = 11 : i64} {
  func.func @kernel(%arg0: i32, %arg1: memref<16x128xf32, #tpu.memory_space<vmem>>, %arg2: memref<16x128xf32, #tpu.memory_space<vmem>>, %arg3: memref<8x128xf32, #tpu.memory_space<vmem>>) attributes {dimension_semantics = [#tpu.dimension_semantics<arbitrary>], iteration_bounds = array<i64: 1>, scalar_prefetch = 0 : i64, scratch_operands = 0 : i64, tpu.core_type = #tpu.core_type<tc>, window_params = [{transform_indices = @transform_0, window_bounds = array<i64: 16, 128>}, {transform_indices = @transform_1, window_bounds = array<i64: 16, 128>}, {pipeline_mode = #tpu.pipeline_mode<synchronous>, transform_indices = @transform_2, window_bounds = array<i64: 8, 128>}]} {
    %c0_i32 = arith.constant 0 : i32
    %0 = arith.cmpi eq, %arg0, %c0_i32 : i32
    %1 = arith.extui %0 : i1 to i32
    %c0_i32_0 = arith.constant 0 : i32
    %2 = arith.cmpi ne, %1, %c0_i32_0 : i32
    scf.if %2 {
      %cst_9 = arith.constant 0.000000e+00 : f32
      %21 = vector.broadcast %cst_9 : f32 to vector<8x128xf32>
      %c0_10 = arith.constant 0 : index
      %c0_11 = arith.constant 0 : index
      %22 = vector.load %arg3[%c0_10, %c0_11] : memref<8x128xf32, #tpu.memory_space<vmem>>, vector<8x128xf32>
      tpu.vector_store %arg3[%c0_10, %c0_11], %21 {strides = array<i32>} : memref<8x128xf32, #tpu.memory_space<vmem>>, vector<8x128xf32>,
    } else {
    }
    %cst = arith.constant 0.000000e+00 : f32
    %3 = vector.broadcast %cst : f32 to vector<8x128xf32>
    %c0_i32_1 = arith.constant 0 : i32
    %c16_i32 = arith.constant 16 : i32
    %4 = arith.muli %c0_i32_1, %c16_i32 : i32
    %5 = tpu.assume_multiple %4, 16 : i32
    %6 = arith.index_cast %5 : i32 to index
    %c0 = arith.constant 0 : index
    %7 = vector.load %arg1[%6, %c0] : memref<16x128xf32, #tpu.memory_space<vmem>>, vector<16x128xf32>
    %8 = arith.index_cast %5 : i32 to index
    %c0_2 = arith.constant 0 : index
    %9 = vector.load %arg2[%8, %c0_2] : memref<16x128xf32, #tpu.memory_space<vmem>>, vector<16x128xf32>
    %10 = arith.subf %7, %9 : vector<16x128xf32>
    %cst_3 = arith.constant 5.000000e-01 : f32
    %11 = vector.broadcast %cst_3 : f32 to vector<16x128xf32>
    %12 = arith.mulf %11, %10 : vector<16x128xf32>
    %13 = math.sin %12 : vector<16x128xf32>
    %14 = arith.mulf %13, %13 : vector<16x128xf32>
    %15 = vector.shape_cast %14 : vector<16x128xf32> to vector<2x8x128xf32>
    %cst_4 = arith.constant dense<0.000000e+00> : vector<8x128xf32>
    %16 = vector.multi_reduction <add>, %15, %cst_4 [0] : vector<2x8x128xf32> to vector<8x128xf32>
    %17 = arith.addf %3, %16 : vector<8x128xf32>
    %c1_i32 = arith.constant 1 : i32
    %c0_5 = arith.constant 0 : index
    %c0_6 = arith.constant 0 : index
    %18 = vector.load %arg3[%c0_5, %c0_6] : memref<8x128xf32, #tpu.memory_space<vmem>>, vector<8x128xf32>
    %19 = arith.addf %18, %17 : vector<8x128xf32>
    %c0_7 = arith.constant 0 : index
    %c0_8 = arith.constant 0 : index
    %20 = vector.load %arg3[%c0_7, %c0_8] : memref<8x128xf32, #tpu.memory_space<vmem>>, vector<8x128xf32>
    tpu.vector_store %arg3[%c0_7, %c0_8], %19 {strides = array<i32>} : memref<8x128xf32, #tpu.memory_space<vmem>>, vector<8x128xf32>,
    return
  }
  func.func @transform_0(%arg0: i32) -> (i32, i32) {
    %c0_i32 = arith.constant 0 : i32
    %c0_i32_0 = arith.constant 0 : i32
    return %arg0, %c0_i32 : i32, i32
  }
  func.func @transform_1(%arg0: i32) -> (i32, i32) {
    %c0_i32 = arith.constant 0 : i32
    %c0_i32_0 = arith.constant 0 : i32
    return %arg0, %c0_i32 : i32, i32
  }
  func.func @transform_2(%arg0: i32) -> (i32, i32) {
    %c0_i32 = arith.constant 0 : i32
    %c0_i32_0 = arith.constant 0 : i32
    %c0_i32_1 = arith.constant 0 : i32
    return %c0_i32, %c0_i32_0 : i32, i32
  }
}

</mosaic_0001>

<bundles_post_ra>
// kernel: tpu_custom_call.1
= control target key start
LH: loop header
LB: loop body
LE: loop exit
PB: predicated region body
PF: predicated region fallthrough
CT: control target
= control target key end

     0   :  { %7 = vsyncpa [#allocation3], 0  ;;  %s499_s0 = inlined_call_operand.hbm [shape: f32[16,128], index: 0, kind: input, shape index: {}]   ;;  %s500_s1 = inlined_call_operand.hbm [shape: f32[16,128], index: 1, kind: input, shape index: {}]   ;;  %s501_s2 = inlined_call_operand.hbm [shape: f32[8,128], index: 2, kind: output, shape index: {}]  }
   0x1   :  { %8 = vsyncpa [#allocation6], 0 }
   0x2   :  { %9 = vsyncpa [#allocation4], 0  ;;  %s386_s9 = smov [#allocation2]  }
   0x3   :  { %s15_s10 = sshll.u32 %s386_s9, 4  ;;  %s16_s10 = int_to_ptr.vmem [resolvable:$true] %s15_s10 }
   0x4   :  { %s328_s11 = scalar_lea.vmem %s16_s10, 256  ;;  %p333_p1 = scmp.lt.s32.totalorder %s16_s10, %s16_s10 }
   0x5   :  { %p329_p0 = scmp.ne.s32.totalorder %s16_s10, %s328_s11  ;;  %p334_p2 = scmp.lt.s32.totalorder %s328_s11, %s328_s11 }
   0x7   :  { %p335_p3 = por %p334_p2, %p333_p1 }
   0x9   :  { %p336_p4 = pnand %p335_p3, %p329_p0 }
   0xb   :  { %339 = shalt.err (!%p336_p4)
}
   0xc   :  { %s387_s12 = smov 128   ;;  %s388_s13 = smov 8  }
   0xd   :  { %21 = dma.hbm_to_vmem [thread:$0]  %s499_s0, 256, %s16_s10, [#allocation3], %s387_s12, %s387_s12, %s388_s13  }
   0xe   :  { %s389_s16 = smov [#allocation5]  }
   0xf   :  { %s27_s17 = sshll.u32 %s389_s16, 4  ;;  %s28_s17 = int_to_ptr.vmem [resolvable:$true] %s27_s17 }
  0x10   :  { %s348_s18 = scalar_lea.vmem %s28_s17, 256  ;;  %p353_p6 = scmp.lt.s32.totalorder %s28_s17, %s28_s17 }
  0x11   :  { %p349_p5 = scmp.ne.s32.totalorder %s28_s17, %s348_s18  ;;  %p354_p7 = scmp.lt.s32.totalorder %s348_s18, %s348_s18 }
  0x13   :  { %p355_p8 = por %p354_p7, %p353_p6 }
  0x15   :  { %p356_p9 = pnand %p355_p8, %p349_p5 }
  0x17   :  { %359 = shalt.err (!%p356_p9)
}
  0x18   :  { %33 = dma.hbm_to_vmem [thread:$0]  %s500_s1, 256, %s28_s17, [#allocation6], %s387_s12, %s387_s12, %s388_s13  }
  0x19   :  { %380 = dma.done.wait [#allocation3], 256  }
  0x1a   :  { %381 = vsyncadd [#allocation3], 4294967040 }
  0x1b   :  { %382 = dma.done.wait [#allocation6], 256  }
  0x1c   :  { %383 = vsyncadd [#allocation6], 4294967040  ;;  %v45_v0 = vld [vmem:[#allocation2] sm:$0xff]  ;;  %v46_v1 = vld [vmem:[#allocation2 + $0x8] sm:$0xff]  ;;  %v390_v30 = vmov 683565275  }
  0x1d   :  { %v47_v2 = vld [vmem:[#allocation5] sm:$0xff]  ;;  %v48_v3 = vld [vmem:[#allocation5 + $0x8] sm:$0xff]  ;;  %v391_v32 = vmov 2475754826   ;;  %v392_v34 = vmov 2131351028  }
  0x1e   :  { %v49_v4 = vsub.f32 %v45_v0, %v47_v2  ;;  %v50_v5 = vsub.f32 %v46_v1, %v48_v3  ;;  %v393_v36 = vmov 2102212464   ;;  %v394_v38 = vmov 920167782   ;;  %s396_s0 = smov [#allocation7]  }
  0x1f   :  { %v395_v46 = vmov 1326507024   ;;  %s274_s1 = sshll.u32 %s396_s0, 4  ;;  %s275_s1 = int_to_ptr.vmem [resolvable:$true] %s274_s1 }
  0x20   :  { %v418_v6 = vmul.f32 0.5, %v49_v4  ;;  %v420_v7 = vmul.f32 0.5, %v50_v5  ;;  %s360_s21 = scalar_lea.vmem %s275_s1, 128  ;;  %p365_p11 = scmp.lt.s32.totalorder %s275_s1, %s275_s1 }
  0x21   :  { %p361_p10 = scmp.ne.s32.totalorder %s275_s1, %s360_s21  ;;  %p366_p12 = scmp.lt.s32.totalorder %s360_s21, %s360_s21 }
  0x22   :  { %v53_v8 = vand.u32 2147483647, %v418_v6  ;;  %v56_v9 = vand.u32 2139095040, %v418_v6  ;;  %v157_v10 = vand.u32 2147483647, %v420_v7  ;;  %v160_v11 = vand.u32 2139095040, %v420_v7 }
  0x23   :  { %vm55_vm14 = vcmp.lt.s32.totalorder %v418_v6, 0  ;;  %p367_p13 = por %p366_p12, %p365_p11 }
  0x24   :  { %v57_v12 = vshrl.u32 %v56_v9, 23  ;;  %v60_v13 = vand.u32 8388607, %v53_v8  ;;  %v161_v14 = vshrl.u32 %v160_v11, 23  ;;  %v164_v15 = vand.u32 8388607, %v157_v10 }
  0x25   :  { %vm481_vm15 = vcmp.le.f32.partialorder %v53_v8, 0.7853982  ;;  %p368_p0 = pnand %p367_p13, %p361_p10 }
  0x26   :  { %v284_v16 = vadd.s32 4294967169, %v57_v12  ;;  %v288_v17 = vadd.s32 4294967169, %v161_v14  ;;  %v61_v19 = vor.u32 8388608, %v60_v13  ;;  %v165_v20 = vor.u32 8388608, %v164_v15 }
  0x28   :  { %v63_v18 = vadd.s32 1, %v284_v16  ;;  %v167_v21 = vadd.s32 1, %v288_v17  ;;  %v430_v26 = vshll.u32 %v61_v19, 8  ;;  %v432_v28 = vshll.u32 %v165_v20, 8 }
  0x2a   :  { %vm64_vm0 = vcmp.gt.s32.totalorder %v63_v18, 0  ;;  %vm168_vm1 = vcmp.gt.s32.totalorder %v167_v21, 0 }
  0x2b   :  { %v65_v22 = vsel %vm64_vm0, %v63_v18, 0  ;;  %v169_v25 = vsel %vm168_vm1, %v167_v21, 0  ;;  %vm159_vm0 = vcmp.lt.s32.totalorder %v420_v7, 0  ;;  %vm158_vm1 = vcmp.le.f32.partialorder %v157_v10, 0.7853982 }
  0x2c   :  { %v66_v23 = vshrl.u32 %v65_v22, 5  ;;  %v67_v24 = vand.u32 31, %v65_v22  ;;  %v171_v27 = vand.u32 31, %v169_v25  ;;  %v434_v40 = vshrl.u32 %v169_v25, 5 }
  0x2e   :  { %v68_v29 = vsub.s32 32, %v67_v24  ;;  %v70_v31 = vshll.u32 %v390_v30, %v67_v24  ;;  %v73_v33 = vshll.u32 %v391_v32, %v67_v24  ;;  %v76_v35 = vshll.u32 %v392_v34, %v67_v24 }
  0x2f   :  { %v79_v37 = vshll.u32 %v393_v36, %v67_v24  ;;  %v82_v39 = vshll.u32 %v394_v38, %v67_v24  ;;  %vm85_vm2 = vcmp.lt.s32.totalorder %v66_v23, 1  ;;  %vm86_vm3 = vcmp.lt.s32.totalorder %v66_v23, 2 }
  0x30   :  { %v69_v41 = vshrl.u32 %v390_v30, %v68_v29  ;;  %v71_v42 = vshrl.u32 %v391_v32, %v68_v29  ;;  %v74_v43 = vshrl.u32 %v392_v34, %v68_v29  ;;  %v77_v44 = vshrl.u32 %v393_v36, %v68_v29 }
  0x31   :  { %v80_v45 = vshrl.u32 %v394_v38, %v68_v29  ;;  %v83_v47 = vshrl.u32 %v395_v46, %v68_v29  ;;  %vm88_vm4 = vcmp.lt.s32.totalorder %v66_v23, 4  ;;  %v172_v51 = vsub.s32 32, %v171_v27 }
  0x32   :  { %v72_v48 = vor.u32 %v71_v42, %v70_v31  ;;  %v75_v49 = vor.u32 %v74_v43, %v73_v33  ;;  %v78_v50 = vor.u32 %v77_v44, %v76_v35  ;;  %vm87_vm5 = vcmp.lt.s32.totalorder %v66_v23, 3 }
  0x33   :  { %v81_v52 = vor.u32 %v80_v45, %v79_v37  ;;  %v84_v53 = vor.u32 %v83_v47, %v82_v39  ;;  %v174_v54 = vshll.u32 %v390_v30, %v171_v27  ;;  %v177_v62 = vshll.u32 %v391_v32, %v171_v27 }
  0x34   :  { %v89_v55 = vsel %vm85_vm2, %v69_v41, %v72_v48  ;;  %v90_v56 = vsel %vm88_vm4, %v78_v50, 2102212464  ;;  %v93_v57 = vsel %vm85_vm2, %v72_v48, %v75_v49  ;;  %v97_v58 = vsel %vm85_vm2, %v75_v49, %v78_v50 }
  0x35   :  { %v91_v59 = vsel %vm87_vm5, %v75_v49, %v90_v56  ;;  %v94_v60 = vsel %vm88_vm4, %v81_v52, 920167782  ;;  %v98_v61 = vsel %vm88_vm4, %v84_v53, 1326507024  ;;  %v173_v1 = vshrl.u32 %v390_v30, %v172_v51 }
  0x36   :  { %v95_v63 = vsel %vm87_vm5, %v78_v50, %v94_v60  ;;  %v99_v0 = vsel %vm87_vm5, %v81_v52, %v98_v61  ;;  %v175_v2 = vshrl.u32 %v391_v32, %v172_v51  ;;  %v92_v3 = vsel %vm86_vm3, %v89_v55, %v91_v59 }
  0x37   :  { %v96_v4 = vsel %vm86_vm3, %v93_v57, %v95_v63  ;;  %v100_v5 = vsel %vm86_vm3, %v97_v58, %v99_v0  ;;  %v178_v9 = vshrl.u32 %v392_v34, %v172_v51  ;;  %v180_v17 = vshll.u32 %v392_v34, %v171_v27 }
  0x38   :  { %v443_v11 = vmul.u32.u64.low %v430_v26, %v100_v5  ;;  %v444_v12 = vmul.u32.u64.high %v430_v26, %v100_v5, %v443_v11  ;;  %v447_v13 = vmul.u32.u64.low %v430_v26, %v96_v4  ;;  %v448_v14 = vmul.u32.u64.high %v430_v26, %v96_v4, %v447_v13 }
  0x39   :  { %v176_v15 = vor.u32 %v175_v2, %v174_v54  ;;  %v179_v16 = vor.u32 %v178_v9, %v177_v62  ;;  %v181_v18 = vshrl.u32 %v393_v36, %v172_v51  ;;  %v183_v19 = vshll.u32 %v393_v36, %v171_v27 }
  0x3a   :  { %v184_v20 = vshrl.u32 %v394_v38, %v172_v51  ;;  %v186_v21 = vshll.u32 %v394_v38, %v171_v27  ;;  %v187_v22 = vshrl.u32 %v395_v46, %v172_v51  ;;  %v108_v23 = vmul.u32 %v430_v26, %v92_v3 }
  0x3b   :  { %v182_v24 = vor.u32 %v181_v18, %v180_v17  ;;  %vm189_vm6 = vcmp.lt.s32.totalorder %v434_v40, 1  ;;  %vm190_vm7 = vcmp.lt.s32.totalorder %v434_v40, 2  ;;  %vm110_vm8 = vc.u32 %v444_v12, %v447_v13 }
  0x3c   :  { %v111_v25 = vadd.s32 1, %v448_v14  ;;  %v185_v29 = vor.u32 %v184_v20, %v183_v19  ;;  %vm191_vm9 = vcmp.lt.s32.totalorder %v434_v40, 3  ;;  %v188_v30 = vor.u32 %v187_v22, %v186_v21 }
  0x3d   :  { %vm192_vm10 = vcmp.lt.s32.totalorder %v434_v40, 4  ;;  %v193_v31 = vsel %vm189_vm6, %v173_v1, %v176_v15  ;;  %v197_v27 = vsel %vm189_vm6, %v176_v15, %v179_v16  ;;  %v201_v34 = vsel %vm189_vm6, %v179_v16, %v182_v24 }
  0x3e   :  { %v112_v32 = vsel %vm110_vm8, %v111_v25, %v448_v14  ;;  %v194_v26 = vsel %vm192_vm10, %v182_v24, 2102212464  ;;  %v198_v33 = vsel %vm192_vm10, %v185_v29, 920167782  ;;  %v202_v38 = vsel %vm192_vm10, %v188_v30, 1326507024 }
  0x3f   :  { %v113_v35 = vadd.s32 %v112_v32, %v108_v23  ;;  %v195_v36 = vsel %vm191_vm9, %v179_v16, %v194_v26  ;;  %v199_v37 = vsel %vm191_vm9, %v182_v24, %v198_v33  ;;  %v203_v42 = vsel %vm191_vm9, %v185_v29, %v202_v38 }
  0x40   :  { %v196_v39 = vsel %vm190_vm7, %v193_v31, %v195_v36  ;;  %v200_v41 = vsel %vm190_vm7, %v197_v27, %v199_v37  ;;  %v204_v44 = vsel %vm190_vm7, %v201_v34, %v203_v42  ;;  %v109_v63 = vadd.s32 %v447_v13, %v444_v12 }
  0x41   :  { %v114_v43 = vadd.s32 536870912, %v113_v35  ;;  %v465_v45 = vmul.u32.u64.low %v432_v28, %v200_v41  ;;  %v466_v46 = vmul.u32.u64.high %v432_v28, %v200_v41, %v465_v45  ;;  %v212_v50 = vmul.u32 %v432_v28, %v196_v39 }
  0x42   :  { %v469_v47 = vmul.u32.u64.low %v432_v28, %v204_v44  ;;  %v470_v48 = vmul.u32.u64.high %v432_v28, %v204_v44, %v469_v47  ;;  %vm145_vm5 = vweird.f32 %v418_v6  ;;  %vm249_vm9 = vweird.f32 %v420_v7 }
  0x43   :  { %v115_v49 = vshrl.u32 %v114_v43, 30  ;;  %v215_v52 = vadd.s32 1, %v466_v46 }
  0x44   :  { %vm214_vm11 = vc.u32 %v470_v48, %v465_v45  ;;  %v213_v19 = vadd.s32 %v465_v45, %v470_v48 }
  0x45   :  { %v116_v51 = vshll.u32 %v115_v49, 30  ;;  %v216_v40 = vsel %vm214_vm11, %v215_v52, %v466_v46  ;;  %v139_v31 = vsub.s32 4, %v115_v49 }
  0x46   :  { %v217_v54 = vadd.s32 %v216_v40, %v212_v50 }
  0x47   :  { %v117_v53 = vsub.s32 %v113_v35, %v116_v51  ;;  %v140_v36 = vsel %vm55_vm14, %v139_v31, %v115_v49 }
  0x48   :  { %v218_v56 = vadd.s32 536870912, %v217_v54  ;;  %v142_v8 = vsel %vm481_vm15, 0, %v140_v36 }
  0x49   :  { %v119_v55 = vsub.s32 0, %v117_v53  ;;  %v146_v42 = vadd.s32 3, %v142_v8 }
  0x4a   :  { %v219_v58 = vshrl.u32 %v218_v56, 30 }
  0x4b   :  { %v285_v57 = vmin.u32 %v119_v55, %v117_v53  ;;  %v147_v46 = vand.u32 3, %v146_v42 }
  0x4c   :  { %v220_v60 = vshll.u32 %v219_v58, 30  ;;  %v243_v39 = vsub.s32 4, %v219_v58 }
  0x4d   :  { %v121_v59 = vclz %v285_v57  ;;  %vm149_vm2 = vcmp.eq.s32.totalorder %v147_v46, 0  ;;  %vm152_vm3 = vcmp.eq.s32.totalorder %v147_v46, 2  ;;  %vm148_vm4 = vcmp.lt.s32.totalorder %v147_v46, 2 }
  0x4e   :  { %v221_v62 = vsub.s32 %v217_v54, %v220_v60  ;;  %v244_v44 = vsel %vm159_vm0, %v243_v39, %v219_v58 }
  0x4f   :  { %v286_v61 = vadd.s32 4294967294, %v121_v59  ;;  %v246_v47 = vsel %vm158_vm1, 0, %v244_v44 }
  0x50   :  { %v223_v0 = vsub.s32 0, %v221_v62  ;;  %v250_v51 = vadd.s32 3, %v246_v47 }
  0x51   :  { %vm287_vm12 = vcmp.lt.s32.totalorder %v286_v61, 0 }
  0x52   :  { %v124_v28 = vsel %vm287_vm12, 0, %v286_v61  ;;  %v289_v4 = vmin.u32 %v223_v0, %v221_v62  ;;  %v251_v40 = vand.u32 3, %v250_v51 }
  0x53   :  { %v125_v1 = vsub.s32 32, %v124_v28  ;;  %v126_v2 = vshll.u32 %v117_v53, %v124_v28  ;;  %v129_v3 = vsub.s32 4294967266, %v124_v28 }
  0x54   :  { %v225_v11 = vclz %v289_v4  ;;  %vm256_vm6 = vcmp.eq.s32.totalorder %v251_v40, 2  ;;  %vm253_vm7 = vcmp.eq.s32.totalorder %v251_v40, 0  ;;  %vm252_vm8 = vcmp.lt.s32.totalorder %v251_v40, 2 }
  0x55   :  { %v127_v5 = vshrl.u32 %v109_v63, %v125_v1  ;;  %v130_v9 = vadd.s32 127, %v129_v3 }
  0x56   :  { %v290_v16 = vadd.s32 4294967294, %v225_v11 }
  0x57   :  { %v128_v14 = vor.u32 %v127_v5, %v126_v2  ;;  %v131_v15 = vshll.u32 %v130_v9, 23 }
  0x58   :  { %vm291_vm13 = vcmp.lt.s32.totalorder %v290_v16, 0 }
  0x59   :  { %v132_v17 = vor.u32 4788187, %v131_v15  ;;  %v135_v18 = vcvt.s32.f32 %v128_v14  ;;  %v228_v12 = vsel %vm291_vm13, 0, %v290_v16 }
  0x5a   :  { %v229_v13 = vsub.s32 32, %v228_v12  ;;  %v230_v21 = vshll.u32 %v221_v62, %v228_v12  ;;  %v233_v22 = vsub.s32 4294967266, %v228_v12 }
  0x5b   :  { %v133_v20 = vand.u32 2147483647, %v132_v17 }
  0x5c   :  { %v231_v24 = vshrl.u32 %v213_v19, %v229_v13  ;;  %v234_v25 = vadd.s32 127, %v233_v22 }
  0x5d   :  { %v136_v23 = vmul.f32 %v135_v18, %v133_v20 }
  0x5e   :  { %v232_v27 = vor.u32 %v231_v24, %v230_v21  ;;  %v235_v32 = vshll.u32 %v234_v25, 23 }
  0x5f   :  { %v137_v30 = vxor.u32 2147483648, %v136_v23 }
  0x60   :  { %v236_v34 = vor.u32 4788187, %v235_v32  ;;  %v239_v35 = vcvt.s32.f32 %v232_v27 }
  0x61   :  { %v138_v26 = vsel %vm55_vm14, %v137_v30, %v136_v23 }
  0x62   :  { %v141_v33 = vsel %vm481_vm15, %v418_v6, %v138_v26  ;;  %v237_v37 = vand.u32 2147483647, %v236_v34 }
  0x63   :  { %312 = vcosq.f32 %v141_v33 }
  0x64   :  { %314 = vsinq.f32 %v141_v33  ;;  %v240_v38 = vmul.f32 %v239_v35, %v237_v37 }
  0x66   :  { %v241_v41 = vxor.u32 2147483648, %v240_v38 }
  0x68   :  { %v242_v43 = vsel %vm159_vm0, %v241_v41, %v240_v38 }
  0x69   :  { %v245_v45 = vsel %vm158_vm1, %v420_v7, %v242_v43 }
  0x6a   :  { %316 = vcosq.f32 %v245_v45 }
  0x6b   :  { %318 = vsinq.f32 %v245_v45 }
  0x70   :  { %v313_v48 = vpop.eup %312 }
  0x71   :  { %v315_v49 = vpop.eup %314  ;;  %v153_v50 = vxor.u32 2147483648, %v313_v48 }
  0x72   :  { %v150_v52 = vxor.u32 2147483648, %v315_v49 }
  0x73   :  { %v154_v10 = vsel %vm152_vm3, %v153_v50, %v315_v49 }
  0x74   :  { %v151_v53 = vsel %vm149_vm2, %v313_v48, %v150_v52 }
  0x75   :  { %v155_v54 = vsel %vm148_vm4, %v151_v53, %v154_v10 }
  0x76   :  { %v156_v58 = vsel %vm145_vm5, nan, %v155_v54 }
  0x77   :  { %v317_v55 = vpop.eup %316  ;;  %v261_v63 = vmul.f32 %v156_v58, %v156_v58 }
  0x78   :  { %v319_v56 = vpop.eup %318  ;;  %v257_v57 = vxor.u32 2147483648, %v317_v55 }
  0x79   :  { %v254_v59 = vxor.u32 2147483648, %v319_v56 }
  0x7a   :  { %v258_v60 = vsel %vm256_vm6, %v257_v57, %v319_v56 }
  0x7b   :  { %v255_v61 = vsel %vm253_vm7, %v317_v55, %v254_v59 }
  0x7c   :  { %v259_v62 = vsel %vm252_vm8, %v255_v61, %v258_v60 }
  0x7d   :  { %v260_v28 = vsel %vm249_vm9, nan, %v259_v62 }
  0x7e   :  { %v262_v0 = vmul.f32 %v260_v28, %v260_v28 }
  0x80   :  { %v263_v6 = vadd.f32 %v262_v0, %v261_v63 }
  0x82   :  { %267 = vst [vmem:[#allocation7] sm:$0xff] %v263_v6 }
  0x83   :  { %371 = shalt.err (!%p368_p0)
}
  0x84   :  { %277 = dma.vmem_to_hbm [thread:$0]  %s275_s1, 128, %s501_s2, [#allocation4]  }
  0x85   :  { %384 = dma.done.wait [#allocation4], 128  }
  0x86   :  { %385 = vsyncadd [#allocation4], 4294967168 }
  0x87   :  { %281 = vsyncpa [#allocation3], 1 }
  0x88   :  { %282 = vsyncpa [#allocation6], 1 }
  0x89   :  { %283 = vsyncpa [#allocation4], 1 }

</bundles_post_ra>
